<compile_context>
chip_gen: v6e
topology: v6e:2x2x1
jax: 0.10.0
libtpu: 0.0.40
codegen_flags: <defaults>
</compile_context>

<pallas_src>
import jax
import jax.numpy as jnp
from jax.experimental import pallas as pl
from jax.experimental.pallas import tpu as pltpu

BN_EPS = 1e-5


def se_dense_kernel(x_ref, scale_ref, shift_ref, wblk_ref, bias_ref,
                    fc1t_ref, fc2_ref, out_ref):
    bt, c, l = x_ref.shape
    g = bias_ref.shape[0]

    x = x_ref[...]                      # (bt, C, L)
    scale = scale_ref[...]              # (C, 1)  folded BN scale
    shift = shift_ref[...]              # (C, 1)  folded BN shift
    w_blk = wblk_ref[...]               # (bt*G, bt*3C)  block-diag conv weight
    bias = bias_ref[...]                # (G, 1)
    fc1t = fc1t_ref[...]                # (G, H)  fc1 transposed
    fc2 = fc2_ref[...]                  # (G, H)

    # Dense-layer passthrough: raw input fills the first C output channels.
    out_ref[:, :c, :] = x.astype(out_ref.dtype)

    # --- BatchNorm (folded, eval) + ReLU, whole tile at once -----------------
    a = jnp.maximum(x * scale + shift, 0.0)                       # (bt, C, L)

    # --- Conv1d(k=3, pad=1): build 3-tap stack for the whole tile -------------
    zero_col = jnp.zeros((bt, c, 1), jnp.float32)
    a_lm1 = jnp.concatenate([zero_col, a[:, :, :-1]], axis=2)     # a[:, :, l-1]
    a_lp1 = jnp.concatenate([a[:, :, 1:], zero_col], axis=2)      # a[:, :, l+1]
    a_stack = jnp.concatenate([a_lm1, a, a_lp1], axis=1)          # (bt, 3C, L)

    # --- Single fused MXU matmul for the entire batch tile --------------------
    rhs = a_stack.reshape(bt * 3 * c, l).astype(w_blk.dtype)      # (bt*3C, L)
    y = jnp.dot(w_blk, rhs, preferred_element_type=jnp.float32)   # (bt*G, L)
    y = y.reshape(bt, g, l) + bias                                # (bt, G, L)

    # --- SEBlock: avg-pool -> fc1 -> ReLU -> fc2 -> sigmoid (VPU/XLU path) ----
    pooled = jnp.mean(y, axis=2, keepdims=True)                   # (bt, G, 1)
    z = jnp.maximum(jnp.sum(fc1t * pooled, axis=1, keepdims=True), 0.0)  # (bt,1,H)
    s = jax.nn.sigmoid(jnp.sum(fc2 * z, axis=2, keepdims=True))   # (bt, G, 1)

    out_ref[:, c:, :] = (y * s).astype(out_ref.dtype)             # (bt, G, L)


def _pick_batch_tile(batch, cap=8):
    bt = min(batch, cap)
    while batch % bt:
        bt -= 1
    return bt


def se_dense_layer(x, params, *, compute_dtype=jnp.float32, batch_tile=None):
    """x: (B, C_in, L) float32. Returns (B, C_in + G, L) == cat([x, se_out], 1)."""
    B, C, L = x.shape
    G = params["w_conv"].shape[0]

    if batch_tile is None:
        batch_tile = _pick_batch_tile(B)
    assert B % batch_tile == 0, (B, batch_tile)

    # --- Fold BatchNorm (eval) into scale/shift --------------------------------
    scale1 = params["gamma"] * jax.lax.rsqrt(params["var"] + BN_EPS)   # (C,)
    shift1 = params["beta"] - params["mean"] * scale1
    scale = scale1.reshape(C, 1).astype(jnp.float32)
    shift = shift1.reshape(C, 1).astype(jnp.float32)

    # --- Fuse the three conv taps into one (G, 3C) weight, then block-diag -----
    w = params["w_conv"]                                               # (G, C, 3)
    w_cat = jnp.concatenate([w[:, :, 0], w[:, :, 1], w[:, :, 2]],
                            axis=1)                                    # (G, 3C)
    w_blk = jnp.kron(jnp.eye(batch_tile, dtype=w_cat.dtype),
                     w_cat).astype(compute_dtype)                      # (bt*G, bt*3C)
    bias = params["b_conv"].reshape(G, 1).astype(jnp.float32)

    # --- SE weights (fc1 pre-transposed for the VPU reduce path) ---------------
    fc1t = params["fc1"].T.astype(jnp.float32)                         # (G, H)
    fc2 = params["fc2"].astype(jnp.float32)                            # (G, H)

    def full2d(arr):
        return pl.BlockSpec(arr.shape, lambda i: (0, 0))

    return pl.pallas_call(
        se_dense_kernel,
        out_shape=jax.ShapeDtypeStruct((B, C + G, L), x.dtype),
        grid_spec=pltpu.PrefetchScalarGridSpec(
            num_scalar_prefetch=0,
            grid=(B // batch_tile,),
            in_specs=[
                pl.BlockSpec((batch_tile, C, L), lambda i: (i, 0, 0)),  # x
                full2d(scale), full2d(shift),
                full2d(w_blk), full2d(bias),
                full2d(fc1t), full2d(fc2),
            ],
            out_specs=pl.BlockSpec((batch_tile, C + G, L),
                                   lambda i: (i, 0, 0)),
        ),
        compiler_params=pltpu.CompilerParams(
            dimension_semantics=("parallel",)),
    )(x, scale, shift, w_blk, bias, fc1t, fc2)


def reference(x, params):
    gamma, beta, mean, var, w_conv, b_conv, fc1, fc2 = (
        params["gamma"], params["beta"], params["mean"], params["var"],
        params["w_conv"], params["b_conv"], params["fc1"], params["fc2"])
    a = (x - mean[None, :, None]) * jax.lax.rsqrt(var + BN_EPS)[None, :, None]
    a = a * gamma[None, :, None] + beta[None, :, None]
    a = jnp.maximum(a, 0.0)
    y = jax.lax.conv_general_dilated(
        a, w_conv, window_strides=(1,), padding=((1, 1),),
        dimension_numbers=("NCH", "OIH", "NCH")) + b_conv[None, :, None]
    pooled = y.mean(-1)                        # (B, G)
    z = jnp.maximum(pooled @ fc1.T, 0.0)       # (B, H)
    s = jax.nn.sigmoid(z @ fc2.T)              # (B, G)
    out = y * s[:, :, None]
    return jnp.concatenate([x, out], axis=1)


if __name__ == "__main__":
    B, C_in, L = 2, 8, 16
    growth_rate = 32
    reduction = 16
    hidden = growth_rate // reduction

    key = jax.random.PRNGKey(0)
    kx, kw, kb, k1, k2 = jax.random.split(key, 5)

    x = jax.random.normal(kx, (B, C_in, L), dtype=jnp.float32)

    params = dict(
        # BatchNorm1d default init + running stats (eval semantics)
        gamma=jnp.ones((C_in,), jnp.float32),
        beta=jnp.zeros((C_in,), jnp.float32),
        mean=jnp.zeros((C_in,), jnp.float32),
        var=jnp.ones((C_in,), jnp.float32),
        # Conv1d(in_channels=C_in, out=growth_rate, k=3, padding=1)
        w_conv=0.1 * jax.random.normal(kw, (growth_rate, C_in, 3), jnp.float32),
        b_conv=0.1 * jax.random.normal(kb, (growth_rate,), jnp.float32),
        # SE fc weights: Linear(G, G//r, bias=False), Linear(G//r, G, bias=False)
        fc1=0.1 * jax.random.normal(k1, (hidden, growth_rate), jnp.float32),
        fc2=0.1 * jax.random.normal(k2, (growth_rate, hidden), jnp.float32),
    )

    out = jax.block_until_ready(se_dense_layer(x, params))
    ref = jax.block_until_ready(reference(x, params))

    assert out.shape == (B, C_in + growth_rate, L), out.shape
    assert jnp.allclose(out, ref, rtol=1e-4, atol=1e-5), float(
        jnp.max(jnp.abs(out - ref)))

    print("KERNEL_OK")
</pallas_src>

<mosaic_0001>
module attributes {stable_mosaic.version = 11 : i64} {
  func.func @se_dense_kernel(%arg0: i32, %arg1: memref<2x8x16xf32, #tpu.memory_space<vmem>>, %arg2: memref<8x1xf32, #tpu.memory_space<vmem>>, %arg3: memref<8x1xf32, #tpu.memory_space<vmem>>, %arg4: memref<64x48xf32, #tpu.memory_space<vmem>>, %arg5: memref<32x1xf32, #tpu.memory_space<vmem>>, %arg6: memref<32x2xf32, #tpu.memory_space<vmem>>, %arg7: memref<32x2xf32, #tpu.memory_space<vmem>>, %arg8: memref<2x40x16xf32, #tpu.memory_space<vmem>>) attributes {dimension_semantics = [#tpu.dimension_semantics<parallel>], iteration_bounds = array<i64: 1>, scalar_prefetch = 0 : i64, scratch_operands = 0 : i64, tpu.core_type = #tpu.core_type<tc>, window_params = [{transform_indices = @transform_0, window_bounds = array<i64: 2, 8, 16>}, {pipeline_mode = #tpu.pipeline_mode<synchronous>, transform_indices = @transform_1, window_bounds = array<i64: 8, 1>}, {pipeline_mode = #tpu.pipeline_mode<synchronous>, transform_indices = @transform_2, window_bounds = array<i64: 8, 1>}, {pipeline_mode = #tpu.pipeline_mode<synchronous>, transform_indices = @transform_3, window_bounds = array<i64: 64, 48>}, {pipeline_mode = #tpu.pipeline_mode<synchronous>, transform_indices = @transform_4, window_bounds = array<i64: 32, 1>}, {pipeline_mode = #tpu.pipeline_mode<synchronous>, transform_indices = @transform_5, window_bounds = array<i64: 32, 2>}, {pipeline_mode = #tpu.pipeline_mode<synchronous>, transform_indices = @transform_6, window_bounds = array<i64: 32, 2>}, {transform_indices = @transform_7, window_bounds = array<i64: 2, 40, 16>}]} {
    %c0 = arith.constant 0 : index
    %c0_0 = arith.constant 0 : index
    %c0_1 = arith.constant 0 : index
    %0 = vector.load %arg1[%c0, %c0_0, %c0_1] : memref<2x8x16xf32, #tpu.memory_space<vmem>>, vector<2x8x16xf32>
    %c0_2 = arith.constant 0 : index
    %c0_3 = arith.constant 0 : index
    %1 = vector.load %arg2[%c0_2, %c0_3] : memref<8x1xf32, #tpu.memory_space<vmem>>, vector<8x1xf32>
    %c0_4 = arith.constant 0 : index
    %c0_5 = arith.constant 0 : index
    %2 = vector.load %arg3[%c0_4, %c0_5] : memref<8x1xf32, #tpu.memory_space<vmem>>, vector<8x1xf32>
    %c0_6 = arith.constant 0 : index
    %c0_7 = arith.constant 0 : index
    %3 = vector.load %arg4[%c0_6, %c0_7] : memref<64x48xf32, #tpu.memory_space<vmem>>, vector<64x48xf32>
    %c0_8 = arith.constant 0 : index
    %c0_9 = arith.constant 0 : index
    %4 = vector.load %arg5[%c0_8, %c0_9] : memref<32x1xf32, #tpu.memory_space<vmem>>, vector<32x1xf32>
    %c0_10 = arith.constant 0 : index
    %c0_11 = arith.constant 0 : index
    %5 = vector.load %arg6[%c0_10, %c0_11] : memref<32x2xf32, #tpu.memory_space<vmem>>, vector<32x2xf32>
    %c0_12 = arith.constant 0 : index
    %c0_13 = arith.constant 0 : index
    %6 = vector.load %arg7[%c0_12, %c0_13] : memref<32x2xf32, #tpu.memory_space<vmem>>, vector<32x2xf32>
    %c0_14 = arith.constant 0 : index
    %c0_15 = arith.constant 0 : index
    %c0_16 = arith.constant 0 : index
    %7 = vector.load %arg8[%c0_14, %c0_15, %c0_16] : memref<2x40x16xf32, #tpu.memory_space<vmem>>, vector<2x8x16xf32>
    tpu.vector_store %arg8[%c0_14, %c0_15, %c0_16], %0 {strides = array<i32>} : memref<2x40x16xf32, #tpu.memory_space<vmem>>, vector<2x8x16xf32>,
    %8 = vector.shape_cast %1 : vector<8x1xf32> to vector<1x8x1xf32>
    %9 = vector.broadcast %8 : vector<1x8x1xf32> to vector<2x8x16xf32>
    %10 = arith.mulf %0, %9 : vector<2x8x16xf32>
    %11 = vector.shape_cast %2 : vector<8x1xf32> to vector<1x8x1xf32>
    %12 = vector.broadcast %11 : vector<1x8x1xf32> to vector<2x8x16xf32>
    %13 = arith.addf %10, %12 : vector<2x8x16xf32>
    %cst = arith.constant 0.000000e+00 : f32
    %14 = vector.broadcast %cst : f32 to vector<2x8x16xf32>
    %15 = arith.maximumf %13, %14 : vector<2x8x16xf32>
    %cst_17 = arith.constant 0.000000e+00 : f32
    %16 = vector.broadcast %cst_17 : f32 to vector<2x8x1xf32>
    %17 = vector.extract_strided_slice %15 {offsets = [0, 0, 0], sizes = [2, 8, 15], strides = [1, 1, 1]} : vector<2x8x16xf32> to vector<2x8x15xf32>
    %18 = tpu.concatenate %16, %17 in 2 : vector<2x8x1xf32>, vector<2x8x15xf32> -> vector<2x8x16xf32>
    %19 = vector.extract_strided_slice %15 {offsets = [0, 0, 1], sizes = [2, 8, 15], strides = [1, 1, 1]} : vector<2x8x16xf32> to vector<2x8x15xf32>
    %20 = tpu.concatenate %19, %16 in 2 : vector<2x8x15xf32>, vector<2x8x1xf32> -> vector<2x8x16xf32>
    %21 = tpu.concatenate %18, %15, %20 in 1 : vector<2x8x16xf32>, vector<2x8x16xf32>, vector<2x8x16xf32> -> vector<2x24x16xf32>
    %22 = vector.shape_cast %21 : vector<2x24x16xf32> to vector<48x16xf32>
    %cst_18 = arith.constant dense<0.000000e+00> : vector<64x16xf32>
    %23 = tpu.matmul %3, %22, %cst_18 {dimension_numbers = #tpu.dot_dimension_numbers<[1], [0], [0], [1], [0, 0, 1, 1], [], []>} : vector<64x48xf32>, vector<48x16xf32>, vector<64x16xf32> -> vector<64x16xf32>
    %24 = vector.shape_cast %23 : vector<64x16xf32> to vector<2x32x16xf32>
    %25 = vector.shape_cast %4 : vector<32x1xf32> to vector<1x32x1xf32>
    %26 = vector.broadcast %25 : vector<1x32x1xf32> to vector<2x32x16xf32>
    %27 = arith.addf %24, %26 : vector<2x32x16xf32>
    %cst_19 = arith.constant dense<0.000000e+00> : vector<2x32xf32>
    %28 = vector.multi_reduction <add>, %27, %cst_19 [2] : vector<2x32x16xf32> to vector<2x32xf32>
    %29 = vector.shape_cast %28 : vector<2x32xf32> to vector<2x32x1xf32>
    %cst_20 = arith.constant 1.600000e+01 : f32
    %30 = vector.broadcast %cst_20 : f32 to vector<2x32x1xf32>
    %31 = arith.divf %29, %30 : vector<2x32x1xf32>
    %32 = vector.shape_cast %5 : vector<32x2xf32> to vector<1x32x2xf32>
    %33 = vector.broadcast %32 : vector<1x32x2xf32> to vector<2x32x2xf32>
    %34 = vector.broadcast %31 : vector<2x32x1xf32> to vector<2x32x2xf32>
    %35 = arith.mulf %33, %34 : vector<2x32x2xf32>
    %cst_21 = arith.constant dense<0.000000e+00> : vector<2x2xf32>
    %36 = vector.multi_reduction <add>, %35, %cst_21 [1] : vector<2x32x2xf32> to vector<2x2xf32>
    %37 = vector.shape_cast %36 : vector<2x2xf32> to vector<2x1x2xf32>
    %cst_22 = arith.constant 0.000000e+00 : f32
    %38 = vector.broadcast %cst_22 : f32 to vector<2x1x2xf32>
    %39 = arith.maximumf %37, %38 : vector<2x1x2xf32>
    %40 = vector.shape_cast %6 : vector<32x2xf32> to vector<1x32x2xf32>
    %41 = vector.broadcast %40 : vector<1x32x2xf32> to vector<2x32x2xf32>
    %42 = vector.broadcast %39 : vector<2x1x2xf32> to vector<2x32x2xf32>
    %43 = arith.mulf %41, %42 : vector<2x32x2xf32>
    %cst_23 = arith.constant dense<0.000000e+00> : vector<2x32xf32>
    %44 = vector.multi_reduction <add>, %43, %cst_23 [2] : vector<2x32x2xf32> to vector<2x32xf32>
    %45 = vector.shape_cast %44 : vector<2x32xf32> to vector<2x32x1xf32>
    %46 = arith.negf %45 : vector<2x32x1xf32>
    %47 = math.exp %46 : vector<2x32x1xf32>
    %cst_24 = arith.constant 1.000000e+00 : f32
    %48 = vector.broadcast %cst_24 : f32 to vector<2x32x1xf32>
    %49 = arith.addf %48, %47 : vector<2x32x1xf32>
    %50 = arith.divf %48, %49 : vector<2x32x1xf32>
    %51 = vector.broadcast %50 : vector<2x32x1xf32> to vector<2x32x16xf32>
    %52 = arith.mulf %27, %51 : vector<2x32x16xf32>
    %c0_25 = arith.constant 0 : index
    %c8 = arith.constant 8 : index
    %c0_26 = arith.constant 0 : index
    %53 = vector.load %arg8[%c0_25, %c8, %c0_26] : memref<2x40x16xf32, #tpu.memory_space<vmem>>, vector<2x32x16xf32>
    tpu.vector_store %arg8[%c0_25, %c8, %c0_26], %52 {strides = array<i32>} : memref<2x40x16xf32, #tpu.memory_space<vmem>>, vector<2x32x16xf32>,
    return
  }
  func.func @transform_0(%arg0: i32) -> (i32, i32, i32) {
    %c0_i32 = arith.constant 0 : i32
    %c0_i32_0 = arith.constant 0 : i32
    %c0_i32_1 = arith.constant 0 : i32
    return %arg0, %c0_i32, %c0_i32_0 : i32, i32, i32
  }
  func.func @transform_1(%arg0: i32) -> (i32, i32) {
    %c0_i32 = arith.constant 0 : i32
    %c0_i32_0 = arith.constant 0 : i32
    %c0_i32_1 = arith.constant 0 : i32
    return %c0_i32, %c0_i32_0 : i32, i32
  }
  func.func @transform_2(%arg0: i32) -> (i32, i32) {
    %c0_i32 = arith.constant 0 : i32
    %c0_i32_0 = arith.constant 0 : i32
    %c0_i32_1 = arith.constant 0 : i32
    return %c0_i32, %c0_i32_0 : i32, i32
  }
  func.func @transform_3(%arg0: i32) -> (i32, i32) {
    %c0_i32 = arith.constant 0 : i32
    %c0_i32_0 = arith.constant 0 : i32
    %c0_i32_1 = arith.constant 0 : i32
    return %c0_i32, %c0_i32_0 : i32, i32
  }
  func.func @transform_4(%arg0: i32) -> (i32, i32) {
    %c0_i32 = arith.constant 0 : i32
    %c0_i32_0 = arith.constant 0 : i32
    %c0_i32_1 = arith.constant 0 : i32
    return %c0_i32, %c0_i32_0 : i32, i32
  }
  func.func @transform_5(%arg0: i32) -> (i32, i32) {
    %c0_i32 = arith.constant 0 : i32
    %c0_i32_0 = arith.constant 0 : i32
    %c0_i32_1 = arith.constant 0 : i32
    return %c0_i32, %c0_i32_0 : i32, i32
  }
  func.func @transform_6(%arg0: i32) -> (i32, i32) {
    %c0_i32 = arith.constant 0 : i32
    %c0_i32_0 = arith.constant 0 : i32
    %c0_i32_1 = arith.constant 0 : i32
    return %c0_i32, %c0_i32_0 : i32, i32
  }
  func.func @transform_7(%arg0: i32) -> (i32, i32, i32) {
    %c0_i32 = arith.constant 0 : i32
    %c0_i32_0 = arith.constant 0 : i32
    %c0_i32_1 = arith.constant 0 : i32
    return %arg0, %c0_i32, %c0_i32_0 : i32, i32, i32
  }
}

</mosaic_0001>

<bundles_post_ra>
// kernel: tpu_custom_call.1
= control target key start
LH: loop header
LB: loop body
LE: loop exit
PB: predicated region body
PF: predicated region fallthrough
CT: control target
= control target key end

     0   :  { %v526_v0 = vmov 0   ;;  %vm50_vm0 = vcmask 130048   ;;  %vm89_vm1 = vcmask 392192   ;;  %s528_s17 = smov 1   ;;  %vm86_vm2 = vcmask 121856   ;;  %s773_s1 = inlined_call_operand.vmem [shape: f32[8,1], index: 1, kind: input, shape index: {}]   ;;  %s774_s2 = inlined_call_operand.vmem [shape: f32[8,1], index: 2, kind: input, shape index: {}]   ;;  %s775_s0 = inlined_call_operand.vmem [shape: f32[2,8,16], index: 0, kind: input, shape index: {}]   ;;  %s776_s7 = inlined_call_operand.vmem [shape: f32[2,40,16], index: 7, kind: output, shape index: {}]   ;;  %s777_s3 = inlined_call_operand.vmem [shape: f32[64,48], index: 3, kind: input, shape index: {}]   ;;  %s778_s4 = inlined_call_operand.vmem [shape: f32[32,1], index: 4, kind: input, shape index: {}]   ;;  %s779_s5 = inlined_call_operand.vmem [shape: f32[32,2], index: 5, kind: input, shape index: {}]   ;;  %s780_s6 = inlined_call_operand.vmem [shape: f32[32,2], index: 6, kind: input, shape index: {}]  }
   0x1   :  { %492 = vset.pattern.permute.xlu0 %v526_v0  ;;  %v28_v1 = vld [vmem:[%s773_s1] sm:$0xff]  ;;  %493 = vset.pattern.permute.xlu1 %v526_v0  ;;  %v27_v3 = vld [vmem:[%s775_s0 + $0x8] sm:$0xff]  ;;  %v40_v16 = vld [vmem:[%s778_s4 + $0x10] sm:$0xff]  ;;  %vm77_vm3 = vcmask 7168   ;;  %vm288_vm5 = vcmask 15360  }
   0x2   :  { %v26_v2 = vld [vmem:[%s775_s0] sm:$0xff]  ;;  %55 = vperm.xlu0 %492, %v28_v1   ;;  %52 = vst.msk [vmem:[%s776_s7 + $0x28] sm:$0xff] %vm50_vm0, %v27_v3  ;;  %v39_v17 = vld [vmem:[%s778_s4 + $0x8] sm:$0xff]  ;;  %v41_v18 = vld [vmem:[%s778_s4 + $0x18] sm:$0xff] }
   0x3   :  { %51 = vst.msk [vmem:[%s776_s7] sm:$0xff] %vm50_vm0, %v26_v2  ;;  %v29_v4 = vld [vmem:[%s774_s2] sm:$0xff]  ;;  %s527_s2 = smov 127   ;;  %vm613_vm4 = vmneg %vm77_vm3  ;;  %v31_v24 = vld [vmem:[%s777_s3 + $0x8] sm:$0xff] }
   0x4   :  { %v30_v11 = vld [vmem:[%s777_s3] sm:$0xff]  ;;  %v35_v25 = vld [vmem:[%s777_s3 + $0x28] sm:$0xff]  ;;  %v32_v26 = vld [vmem:[%s777_s3 + $0x10] sm:$0xff] }
   0x5   :  { %v34_v12 = vld [vmem:[%s777_s3 + $0x20] sm:$0xff]  ;;  %465 = vmatprep.mubr.msk.f32.mxu0 %vm89_vm1, %v30_v11  ;;  %v36_v27 = vld [vmem:[%s777_s3 + $0x30] sm:$0xff]  ;;  %v33_v28 = vld [vmem:[%s777_s3 + $0x18] sm:$0xff] }
   0x6   :  { %62 = vperm.xlu0 %492, %v29_v4   ;;  %471 = vmatprep.mubr.msk.f32.mxu1 %vm89_vm1, %v34_v12  ;;  %v38_v15 = vld [vmem:[%s778_s4] sm:$0xff]  ;;  %v37_v29 = vld [vmem:[%s777_s3 + $0x38] sm:$0xff]  ;;  %v43_v61 = vld [vmem:[%s779_s5 + $0x8] sm:$0xff] }
   0x7   :  { %v42_v62 = vld [vmem:[%s779_s5] sm:$0xff] }
  0x7d   :  { %v56_v5 = vpop.permute.xlu0 %55 }
  0x7e   :  { %v58_v6 = vmul.f32 %v56_v5, %v26_v2  ;;  %v59_v7 = vmul.f32 %v56_v5, %v27_v3  ;;  %v44_v2 = vld [vmem:[%s779_s5 + $0x10] sm:$0xff] }
  0x81   :  { %v63_v8 = vpop.permute.xlu0 %62 }
  0x82   :  { %v65_v9 = vadd.f32 %v63_v8, %v58_v6  ;;  %v66_v10 = vadd.f32 %v63_v8, %v59_v7 }
  0x84   :  { %v67_v13 = vmax.f32 %v65_v9, 0.0  ;;  %v68_v14 = vmax.f32 %v66_v10, 0.0 }
  0x86   :  { %82 = vrot.lane.b32.xlu1 %v68_v14, %s527_s2  ;;  %80 = vrot.lane.b32.xlu0 %v67_v13, %s527_s2 }
  0x8a   :  { %73 = vrot.lane.b32.xlu1 %v68_v14, %s528_s17  ;;  %221 = vperm.xlu0 %492, %v38_v15  }
  0x8e   :  { %71 = vrot.lane.b32.xlu1 %v67_v13, %s528_s17  ;;  %231 = vperm.xlu0 %492, %v40_v16  }
  0x92   :  { %226 = vperm.xlu1 %493, %v39_v17  }
  0x96   :  { %236 = vperm.xlu1 %493, %v41_v18  }
  0xf8   :  { %v83_v19 = vpop.permute.xlu1 %82  ;;  %v81_v22 = vpop.permute.xlu0 %80 }
  0xf9   :  { %453 = vmatprep.subr.msk.mxu0 %vm86_vm2, %v83_v19  ;;  %477 = vmatprep.subr.msk.mxu1 %vm86_vm2, %v83_v19 }
  0xfa   :  { %454 = vmatpush3.msk.msra.mxu0 %vm86_vm2, %v83_v19  ;;  %483 = vmatpush3.msk.msra.mxu1 %vm86_vm2, %v83_v19 }
  0xfb   :  { %455 = vmatprep.subr.mxu0 %v68_v14  ;;  %478 = vmatprep.subr.mxu1 %v68_v14 }
  0xfc   :  { %456 = vmatpush3.msra.mxu0 %v68_v14  ;;  %484 = vmatpush3.msra.mxu1 %v68_v14  ;;  %v74_v21 = vpop.permute.xlu1 %73 }
  0xfd   :  { %457 = vmatprep.subr.msk.mxu0 %vm613_vm4, %v74_v21  ;;  %479 = vmatprep.subr.msk.mxu1 %vm613_vm4, %v74_v21 }
  0xfe   :  { %458 = vmatpush3.msk.msra.mxu0 %vm613_vm4, %v74_v21  ;;  %485 = vmatpush3.msk.msra.mxu1 %vm613_vm4, %v74_v21 }
  0xff   :  { %459 = vmatprep.subr.msk.mxu0 %vm86_vm2, %v81_v22  ;;  %480 = vmatprep.subr.msk.mxu1 %vm86_vm2, %v81_v22 }
 0x100   :  { %460 = vmatpush3.msk.msra.mxu0 %vm86_vm2, %v81_v22  ;;  %486 = vmatpush3.msk.msra.mxu1 %vm86_vm2, %v81_v22  ;;  %v72_v23 = vpop.permute.xlu1 %71 }
 0x101   :  { %461 = vmatprep.subr.mxu0 %v67_v13  ;;  %481 = vmatprep.subr.mxu1 %v67_v13 }
 0x102   :  { %462 = vmatpush3.msra.mxu0 %v67_v13  ;;  %487 = vmatpush3.msra.mxu1 %v67_v13  ;;  %v45_v13 = vld [vmem:[%s779_s5 + $0x18] sm:$0xff] }
 0x103   :  { %463 = vmatprep.subr.msk.mxu0 %vm613_vm4, %v72_v23  ;;  %482 = vmatprep.subr.msk.mxu1 %vm613_vm4, %v72_v23 }
 0x104   :  { %464 = vmatpush3.msk.msra.mxu0 %vm613_vm4, %v72_v23  ;;  %488 = vmatpush3.msk.msra.mxu1 %vm613_vm4, %v72_v23 }
 0x105   :  { %466 = vmatmul.mubr.msk.f32.vlgmr.msra.gmra.mxu0 %vm89_vm1, %v31_v24  ;;  %472 = vmatmul.mubr.msk.f32.vlgmr.msra.gmra.mxu1 %vm89_vm1, %v35_v25  ;;  %v222_v30 = vpop.permute.xlu0 %221 }
 0x106   :  { %468 = vmatprep.mubr.msk.f32.mxu0 %vm89_vm1, %v32_v26  ;;  %474 = vmatprep.mubr.msk.f32.mxu1 %vm89_vm1, %v36_v27 }
 0x109   :  { %469 = vmatmul.mubr.msk.f32.gmra.mxu0 %vm89_vm1, %v33_v28  ;;  %475 = vmatmul.mubr.msk.f32.gmra.mxu1 %vm89_vm1, %v37_v29  ;;  %v232_v43 = vpop.permute.xlu0 %231 }
 0x10d   :  { %v227_v31 = vpop.permute.xlu1 %226 }
 0x111   :  { %v237_v48 = vpop.permute.xlu1 %236 }
 0x1c5   :  { %v467_v32 = vpop.f32.mrf.mxu0  ;;  %v473_v33 = vpop.f32.mrf.mxu1 }
 0x1c6   :  { %v661_v34 = vadd.f32 %v467_v32, %v227_v31  ;;  %v663_v35 = vadd.f32 %v473_v33, %v227_v31 }
 0x1c7   :  { %v180_v36 = vpop.f32.mrf.mxu0  ;;  %v200_v37 = vpop.f32.mrf.mxu1 }
 0x1c8   :  { %v665_v38 = vadd.f32 %v222_v30, %v180_v36  ;;  %v262_v39 = vsel %vm50_vm0, %v663_v35, 0.0  ;;  %v250_v40 = vsel %vm50_vm0, %v661_v34, 0.0  ;;  %v671_v45 = vadd.f32 %v222_v30, %v200_v37 }
 0x1c9   :  { %263 = vadd.xlane.f32.xlu0 %v262_v39  ;;  %v476_v41 = vpop.f32.mrf.mxu1  ;;  %251 = vadd.xlane.f32.xlu1 %v250_v40  ;;  %v470_v42 = vpop.f32.mrf.mxu0 }
 0x1ca   :  { %v247_v47 = vsel %vm50_vm0, %v665_v38, 0.0  ;;  %v677_v50 = vadd.f32 %v470_v42, %v237_v48  ;;  %v259_v53 = vsel %vm50_vm0, %v671_v45, 0.0  ;;  %v687_v55 = vadd.f32 %v476_v41, %v237_v48 }
 0x1cb   :  { %v190_v44 = vpop.f32.mrf.mxu0  ;;  %v210_v49 = vpop.f32.mrf.mxu1 }
 0x1cc   :  { %v673_v46 = vadd.f32 %v232_v43, %v190_v44  ;;  %v681_v52 = vadd.f32 %v232_v43, %v210_v49  ;;  %v256_v54 = vsel %vm50_vm0, %v677_v50, 0.0  ;;  %v268_v57 = vsel %vm50_vm0, %v687_v55, 0.0 }
 0x1cd   :  { %248 = vadd.xlane.f32.xlu0 %v247_v47 }
 0x1ce   :  { %v253_v51 = vsel %vm50_vm0, %v673_v46, 0.0  ;;  %v265_v56 = vsel %vm50_vm0, %v681_v52, 0.0 }
 0x1cf   :  { %254 = vadd.xlane.f32.xlu1 %v253_v51  ;;  %v47_v51 = vld [vmem:[%s780_s6 + $0x8] sm:$0xff] }
 0x1d1   :  { %260 = vadd.xlane.f32.xlu0 %v259_v53  ;;  %v46_v53 = vld [vmem:[%s780_s6] sm:$0xff] }
 0x1d3   :  { %257 = vadd.xlane.f32.xlu1 %v256_v54 }
 0x1d5   :  { %266 = vadd.xlane.f32.xlu0 %v265_v56 }
 0x1d9   :  { %269 = vadd.xlane.f32.xlu0 %v268_v57  ;;  %v49_v57 = vld [vmem:[%s780_s6 + $0x18] sm:$0xff] }
 0x252   :  { %v252_v58 = vpop.xlane.xlu1 %251  ;;  %v264_v59 = vpop.xlane.xlu0 %263 }
 0x253   :  { %v273_v60 = vmul.f32 0.0625, %v252_v58  ;;  %v277_v6 = vmul.f32 0.0625, %v264_v59  ;;  %v48_v58 = vld [vmem:[%s780_s6 + $0x10] sm:$0xff] }
 0x255   :  { %v281_v0 = vmul.f32 %v273_v60, %v43_v61  ;;  %v285_v19 = vmul.f32 %v277_v6, %v43_v61 }
 0x256   :  { %v249_v63 = vpop.xlane.xlu0 %248 }
 0x257   :  { %v272_v1 = vmul.f32 0.0625, %v249_v63  ;;  %v290_v8 = vsel %vm288_vm5, %v281_v0, 0.0  ;;  %v303_v28 = vsel %vm288_vm5, %v285_v19, 0.0 }
 0x258   :  { %v255_v3 = vpop.xlane.xlu1 %254 }
 0x259   :  { %v280_v4 = vmul.f32 %v272_v1, %v42_v62  ;;  %v274_v5 = vmul.f32 0.0625, %v255_v3 }
 0x25a   :  { %v261_v7 = vpop.xlane.xlu0 %260 }
 0x25b   :  { %v289_v9 = vsel %vm288_vm5, %v280_v4, 0.0  ;;  %v282_v10 = vmul.f32 %v274_v5, %v44_v2  ;;  %v276_v11 = vmul.f32 0.0625, %v261_v7 }
 0x25c   :  { %v291_v12 = vadd.f32 %v290_v8, %v289_v9  ;;  %v258_v14 = vpop.xlane.xlu1 %257 }
 0x25d   :  { %v292_v15 = vsel %vm288_vm5, %v282_v10, 0.0  ;;  %v284_v16 = vmul.f32 %v276_v11, %v42_v62  ;;  %v275_v17 = vmul.f32 0.0625, %v258_v14 }
 0x25e   :  { %v267_v18 = vpop.xlane.xlu0 %266  ;;  %v293_v22 = vadd.f32 %v292_v15, %v291_v12 }
 0x25f   :  { %v283_v20 = vmul.f32 %v275_v17, %v45_v13  ;;  %v278_v21 = vmul.f32 0.0625, %v267_v18  ;;  %v302_v23 = vsel %vm288_vm5, %v284_v16, 0.0 }
 0x260   :  { %v304_v31 = vadd.f32 %v303_v28, %v302_v23 }
 0x261   :  { %v294_v24 = vsel %vm288_vm5, %v283_v20, 0.0  ;;  %v286_v25 = vmul.f32 %v278_v21, %v44_v2 }
 0x262   :  { %v295_v26 = vadd.f32 %v294_v24, %v293_v22  ;;  %v270_v27 = vpop.xlane.xlu0 %269 }
 0x263   :  { %v305_v29 = vsel %vm288_vm5, %v286_v25, 0.0  ;;  %v279_v30 = vmul.f32 0.0625, %v270_v27 }
 0x264   :  { %v296_v32 = vrot.slane %v295_v26, 4  ;;  %v306_v37 = vadd.f32 %v305_v29, %v304_v31 }
 0x265   :  { %v287_v33 = vmul.f32 %v279_v30, %v45_v13 }
 0x266   :  { %v297_v36 = vadd.f32 %v296_v32, %v295_v26 }
 0x267   :  { %v307_v39 = vsel %vm288_vm5, %v287_v33, 0.0 }
 0x268   :  { %v298_v40 = vrot.slane %v297_v36, 2  ;;  %v308_v41 = vadd.f32 %v307_v39, %v306_v37 }
 0x26a   :  { %v299_v42 = vadd.f32 %v298_v40, %v297_v36  ;;  %v309_v43 = vrot.slane %v308_v41, 4 }
 0x26c   :  { %v300_v44 = vrot.slane %v299_v42, 1  ;;  %v310_v47 = vadd.f32 %v309_v43, %v308_v41 }
 0x26e   :  { %v311_v48 = vrot.slane %v310_v47, 2  ;;  %v301_v49 = vadd.f32 %v300_v44, %v299_v42 }
 0x270   :  { %v312_v54 = vadd.f32 %v311_v48, %v310_v47  ;;  %v315_v56 = vmax.f32 %v301_v49, 0.0 }
 0x272   :  { %v313_v59 = vrot.slane %v312_v54, 1  ;;  %v318_v60 = vmul.f32 %v315_v56, %v47_v51  ;;  %v317_v61 = vmul.f32 %v315_v56, %v46_v53  ;;  %v320_v62 = vmul.f32 %v315_v56, %v49_v57 }
 0x273   :  { %v319_v1 = vmul.f32 %v315_v56, %v48_v58 }
 0x274   :  { %v328_v63 = vsel %vm288_vm5, %v318_v60, 0.0  ;;  %v325_v0 = vsel %vm288_vm5, %v317_v61, 0.0  ;;  %v314_v2 = vadd.f32 %v313_v59, %v312_v54  ;;  %v334_v4 = vsel %vm288_vm5, %v320_v62, 0.0 }
 0x275   :  { %329 = vadd.xlane.f32.xlu0 %v328_v63  ;;  %326 = vadd.xlane.f32.xlu1 %v325_v0  ;;  %v331_v5 = vsel %vm288_vm5, %v319_v1, 0.0 }
 0x276   :  { %v316_v3 = vmax.f32 %v314_v2, 0.0 }
 0x278   :  { %v322_v6 = vmul.f32 %v316_v3, %v47_v51  ;;  %v321_v7 = vmul.f32 %v316_v3, %v46_v53  ;;  %v324_v10 = vmul.f32 %v316_v3, %v49_v57  ;;  %v323_v11 = vmul.f32 %v316_v3, %v48_v58 }
 0x279   :  { %335 = vadd.xlane.f32.xlu0 %v334_v4  ;;  %332 = vadd.xlane.f32.xlu1 %v331_v5 }
 0x27a   :  { %v340_v8 = vsel %vm288_vm5, %v322_v6, 0.0  ;;  %v337_v9 = vsel %vm288_vm5, %v321_v7, 0.0  ;;  %v346_v12 = vsel %vm288_vm5, %v324_v10, 0.0  ;;  %v343_v13 = vsel %vm288_vm5, %v323_v11, 0.0 }
 0x27d   :  { %341 = vadd.xlane.f32.xlu0 %v340_v8  ;;  %338 = vadd.xlane.f32.xlu1 %v337_v9 }
 0x281   :  { %347 = vadd.xlane.f32.xlu0 %v346_v12  ;;  %344 = vadd.xlane.f32.xlu1 %v343_v13 }
 0x2fe   :  { %v327_v14 = vpop.xlane.xlu1 %326  ;;  %v330_v15 = vpop.xlane.xlu0 %329 }
 0x2ff   :  { %v431_v16 = vmul.f32 -1.442695, %v327_v14  ;;  %v432_v17 = vmul.f32 -1.442695, %v330_v15 }
 0x301   :  { %494 = vpow2.f32 %v431_v16 }
 0x302   :  { %496 = vpow2.f32 %v432_v17  ;;  %v333_v18 = vpop.xlane.xlu1 %332  ;;  %v336_v19 = vpop.xlane.xlu0 %335 }
 0x303   :  { %v433_v20 = vmul.f32 -1.442695, %v333_v18  ;;  %v434_v21 = vmul.f32 -1.442695, %v336_v19 }
 0x305   :  { %498 = vpow2.f32 %v433_v20 }
 0x306   :  { %500 = vpow2.f32 %v434_v21  ;;  %v339_v22 = vpop.xlane.xlu1 %338  ;;  %v342_v23 = vpop.xlane.xlu0 %341 }
 0x307   :  { %v435_v24 = vmul.f32 -1.442695, %v339_v22  ;;  %v436_v25 = vmul.f32 -1.442695, %v342_v23 }
 0x309   :  { %502 = vpow2.f32 %v435_v24 }
 0x30a   :  { %504 = vpow2.f32 %v436_v25  ;;  %v345_v26 = vpop.xlane.xlu1 %344  ;;  %v348_v27 = vpop.xlane.xlu0 %347 }
 0x30b   :  { %v437_v28 = vmul.f32 -1.442695, %v345_v26  ;;  %v438_v29 = vmul.f32 -1.442695, %v348_v27 }
 0x30d   :  { %506 = vpow2.f32 %v437_v28 }
 0x30e   :  { %v495_v30 = vpop.eup %494  ;;  %508 = vpow2.f32 %v438_v29 }
 0x30f   :  { %v497_v31 = vpop.eup %496  ;;  %v373_v32 = vadd.f32 1.0, %v495_v30 }
 0x310   :  { %v374_v33 = vadd.f32 1.0, %v497_v31 }
 0x311   :  { %510 = vrcp.f32 %v373_v32 }
 0x312   :  { %v499_v36 = vpop.eup %498  ;;  %512 = vrcp.f32 %v374_v33 }
 0x313   :  { %v501_v37 = vpop.eup %500  ;;  %v375_v39 = vadd.f32 1.0, %v499_v36 }
 0x314   :  { %v376_v40 = vadd.f32 1.0, %v501_v37 }
 0x315   :  { %514 = vrcp.f32 %v375_v39 }
 0x316   :  { %v503_v41 = vpop.eup %502  ;;  %516 = vrcp.f32 %v376_v40 }
 0x317   :  { %v505_v42 = vpop.eup %504  ;;  %v377_v43 = vadd.f32 1.0, %v503_v41 }
 0x318   :  { %v378_v44 = vadd.f32 1.0, %v505_v42 }
 0x319   :  { %518 = vrcp.f32 %v377_v43 }
 0x31a   :  { %v507_v47 = vpop.eup %506  ;;  %520 = vrcp.f32 %v378_v44 }
 0x31b   :  { %v509_v48 = vpop.eup %508  ;;  %v379_v49 = vadd.f32 1.0, %v507_v47 }
 0x31c   :  { %v380_v51 = vadd.f32 1.0, %v509_v48 }
 0x31d   :  { %522 = vrcp.f32 %v379_v49 }
 0x31e   :  { %v511_v53 = vpop.eup %510  ;;  %524 = vrcp.f32 %v380_v51 }
 0x31f   :  { %v513_v54 = vpop.eup %512  ;;  %v397_v56 = vmul.f32 %v511_v53, %v665_v38 }
 0x320   :  { %v398_v57 = vmul.f32 %v513_v54, %v661_v34 }
 0x321   :  { %405 = vst.msk [vmem:[%s776_s7 + $0x8] sm:$0xff] %vm50_vm0, %v397_v56 }
 0x322   :  { %v515_v58 = vpop.eup %514  ;;  %406 = vst.msk [vmem:[%s776_s7 + $0x10] sm:$0xff] %vm50_vm0, %v398_v57 }
 0x323   :  { %v517_v59 = vpop.eup %516  ;;  %v399_v60 = vmul.f32 %v515_v58, %v673_v46 }
 0x324   :  { %v400_v61 = vmul.f32 %v517_v59, %v677_v50 }
 0x325   :  { %407 = vst.msk [vmem:[%s776_s7 + $0x18] sm:$0xff] %vm50_vm0, %v399_v60 }
 0x326   :  { %v519_v34 = vpop.eup %518  ;;  %408 = vst.msk [vmem:[%s776_s7 + $0x20] sm:$0xff] %vm50_vm0, %v400_v61 }
 0x327   :  { %v521_v38 = vpop.eup %520  ;;  %v401_v62 = vmul.f32 %v519_v34, %v671_v45 }
 0x328   :  { %v402_v63 = vmul.f32 %v521_v38, %v663_v35 }
 0x329   :  { %409 = vst.msk [vmem:[%s776_s7 + $0x30] sm:$0xff] %vm50_vm0, %v401_v62 }
 0x32a   :  { %v523_v46 = vpop.eup %522  ;;  %410 = vst.msk [vmem:[%s776_s7 + $0x38] sm:$0xff] %vm50_vm0, %v402_v63 }
 0x32b   :  { %v525_v50 = vpop.eup %524  ;;  %v403_v0 = vmul.f32 %v523_v46, %v681_v52 }
 0x32c   :  { %v404_v1 = vmul.f32 %v525_v50, %v687_v55 }
 0x32d   :  { %411 = vst.msk [vmem:[%s776_s7 + $0x40] sm:$0xff] %vm50_vm0, %v403_v0 }
 0x32e   :  { %412 = vst.msk [vmem:[%s776_s7 + $0x48] sm:$0xff] %vm50_vm0, %v404_v1 }

</bundles_post_ra>
